<compile_context>
chip_gen: v7x
topology: tpu7x:2x2x1
jax: 0.10.0
libtpu: 0.0.40
codegen_flags: <defaults>
</compile_context>

<pallas_src>
import functools
import math

import jax
import jax.numpy as jnp
from jax.experimental import pallas as pl
from jax.experimental.pallas import tpu as pltpu

LANE = 128      # lane-dense padding; 256 alignment only pays off when the
SUBLANE = 8     # kernel becomes MXU-bound (large B) on v6e/v7x.


def _ceil_to(v, m):
    return ((v + m - 1) // m) * m


# --------------------------------------------------------------------------
# Kernels
# --------------------------------------------------------------------------
def _block_kernel(x_ref, wh_ref, bh_ref, wf_ref, bf_ref, o_ref, h_ref, *,
                  n_layers, slope):
    """Grid = (batch_tiles, n_layers); one hidden layer per step.

    x_ref:  (tb, fin_p)          input tile (fetched once per batch tile)
    wh_ref: (1, fin_p, fin_p)    hidden weight of layer l (bf16, streamed)
    bh_ref: (1, 1, fin_p)        hidden bias of layer l (f32)
    wf_ref: (fin_p, fout_p)      final weight (bf16, resident; constant index)
    bf_ref: (1, fout_p)          final bias (f32)
    o_ref:  (tb, fout_p)         output tile (written at the last layer step)
    h_ref:  (tb, fin_p) f32      running activation, persists across layer axis
    """
    l = pl.program_id(1)

    @pl.when(l == 0)
    def _():
        h_ref[...] = x_ref[...].astype(jnp.float32)

    # Hidden layer l: bf16 matmul on the MXU, f32 accumulate, bias, LeakyReLU.
    y = jnp.dot(h_ref[...].astype(jnp.bfloat16), wh_ref[0],
                preferred_element_type=jnp.float32) + bh_ref[0]
    h_ref[...] = jnp.where(y >= 0.0, y, y * slope)

    @pl.when(l == n_layers - 1)
    def _():
        o = jnp.dot(h_ref[...].astype(jnp.bfloat16), wf_ref[...],
                    preferred_element_type=jnp.float32) + bf_ref[...]
        o_ref[...] = o.astype(o_ref.dtype)


def _final_only_kernel(x_ref, wf_ref, bf_ref, o_ref):
    """n_layers == 0 variant: just the final EqualLinear, no dummy operands."""
    o = jnp.dot(x_ref[...].astype(jnp.bfloat16), wf_ref[...],
                preferred_element_type=jnp.float32) + bf_ref[...]
    o_ref[...] = o.astype(o_ref.dtype)


# --------------------------------------------------------------------------
# One-time parameter preparation
# --------------------------------------------------------------------------
def prepare_equal_linear_block(params, *, lr_mul):
    """Fold lr_mul, transpose to (fin, fout), pad features to 128, weights->bf16.

    params: list of (w, b); hidden layers are (fin, fin)/(fin,), final (fout, fin)/(fout,).
    Zero padding is exact: padded features carry exact zeros through the
    zero-padded bias and LeakyReLU and contribute nothing downstream.
    """
    *hidden, (w_f, b_f) = params
    n_layers = len(hidden)
    fin = w_f.shape[1]
    fout = w_f.shape[0]
    fin_p = _ceil_to(fin, LANE)
    fout_p = _ceil_to(fout, LANE)

    if n_layers > 0:
        wh = jnp.zeros((n_layers, fin_p, fin_p), jnp.bfloat16)
        bh = jnp.zeros((n_layers, 1, fin_p), jnp.float32)
        for i, (w, b) in enumerate(hidden):
            wh = wh.at[i, :fin, :fin].set((w * lr_mul).T.astype(jnp.bfloat16))
            bh = bh.at[i, 0, :fin].set((b * lr_mul).astype(jnp.float32))
    else:
        wh, bh = None, None

    wf = jnp.zeros((fin_p, fout_p), jnp.bfloat16)
    wf = wf.at[:fin, :fout].set((w_f * lr_mul).T.astype(jnp.bfloat16))
    bf = jnp.zeros((1, fout_p), jnp.float32)
    bf = bf.at[0, :fout].set((b_f * lr_mul).astype(jnp.float32))

    return dict(wh=wh, bh=bh, wf=wf, bf=bf,
                n_layers=n_layers, fin=fin, fout=fout,
                fin_p=fin_p, fout_p=fout_p)


def _vmem_limit_bytes(tb, fin_p, fout_p, x_itemsize, out_itemsize):
    need = (2 * tb * fin_p * x_itemsize        # x tile, double-buffered
            + 2 * fin_p * fin_p * 2            # hidden weight block (bf16), x2
            + 2 * fin_p * 4                    # hidden bias block
            + 2 * fin_p * fout_p * 2           # final weight (bf16), x2
            + 2 * fout_p * 4                   # final bias
            + 2 * tb * fout_p * out_itemsize   # output tile, double-buffered
            + tb * fin_p * 4)                  # h scratch
    need = int(need * 1.5) + (1 << 20)
    # Never exceed v7x's 64 MiB physical VMEM; never go below the v6e default.
    return min(64 * 1024 * 1024, max(32 * 1024 * 1024, need))


# --------------------------------------------------------------------------
# Forward
# --------------------------------------------------------------------------
def equal_linear_block_forward(x, prepared, *, leaky_slope=0.2, block_b=256):
    """Fused forward: x (B, fin) -> (B, fout)."""
    B, fin = x.shape
    assert fin == prepared["fin"]
    fin_p, fout_p = prepared["fin_p"], prepared["fout_p"]
    fout = prepared["fout"]
    n_layers = prepared["n_layers"]
    out_dtype = x.dtype
    x_itemsize = jnp.dtype(x.dtype).itemsize
    out_itemsize = jnp.dtype(out_dtype).itemsize

    # Batch tiling: keep the running activation tile small enough to live in
    # vregs; the leading grid axis is "parallel" (v7x second TensorCore).
    tb = min(_ceil_to(max(B, 1), SUBLANE), block_b)
    Bp = _ceil_to(B, tb)
    nb = Bp // tb

    # Skip the wrapper-side pad copy when already aligned.
    if (Bp, fin_p) == (B, fin):
        x_pad = x
    else:
        x_pad = jnp.zeros((Bp, fin_p), x.dtype).at[:B, :fin].set(x)

    flops = 2 * Bp * fin_p * fin_p * n_layers + 2 * Bp * fin_p * fout_p
    bytes_accessed = (Bp * fin_p * x_itemsize
                      + nb * n_layers * (fin_p * fin_p * 2 + fin_p * 4)
                      + fin_p * fout_p * 2 + fout_p * 4
                      + Bp * fout_p * out_itemsize)
    cost = pl.CostEstimate(flops=int(flops), transcendentals=0,
                           bytes_accessed=int(bytes_accessed))
    vmem_limit = _vmem_limit_bytes(tb, fin_p, fout_p, x_itemsize, out_itemsize)

    if n_layers > 0:
        kernel = functools.partial(_block_kernel, n_layers=n_layers,
                                   slope=float(leaky_slope))
        grid_spec = pltpu.PrefetchScalarGridSpec(
            num_scalar_prefetch=0,
            grid=(nb, n_layers),
            in_specs=[
                pl.BlockSpec((tb, fin_p), lambda b, l: (b, 0)),           # x
                pl.BlockSpec((1, fin_p, fin_p), lambda b, l: (l, 0, 0)),  # wh (streamed)
                pl.BlockSpec((1, 1, fin_p), lambda b, l: (l, 0, 0)),      # bh
                pl.BlockSpec((fin_p, fout_p), lambda b, l: (0, 0)),       # wf (resident)
                pl.BlockSpec((1, fout_p), lambda b, l: (0, 0)),           # bf
            ],
            out_specs=pl.BlockSpec((tb, fout_p), lambda b, l: (b, 0)),
            scratch_shapes=[pltpu.VMEM((tb, fin_p), jnp.float32)],        # h
        )
        out = pl.pallas_call(
            kernel,
            out_shape=jax.ShapeDtypeStruct((Bp, fout_p), out_dtype),
            grid_spec=grid_spec,
            compiler_params=pltpu.CompilerParams(
                dimension_semantics=("parallel", "arbitrary"),
                vmem_limit_bytes=vmem_limit),
            cost_estimate=cost,
        )(x_pad, prepared["wh"], prepared["bh"], prepared["wf"], prepared["bf"])
    else:
        grid_spec = pltpu.PrefetchScalarGridSpec(
            num_scalar_prefetch=0,
            grid=(nb,),
            in_specs=[
                pl.BlockSpec((tb, fin_p), lambda b: (b, 0)),
                pl.BlockSpec((fin_p, fout_p), lambda b: (0, 0)),
                pl.BlockSpec((1, fout_p), lambda b: (0, 0)),
            ],
            out_specs=pl.BlockSpec((tb, fout_p), lambda b: (b, 0)),
        )
        out = pl.pallas_call(
            _final_only_kernel,
            out_shape=jax.ShapeDtypeStruct((Bp, fout_p), out_dtype),
            grid_spec=grid_spec,
            compiler_params=pltpu.CompilerParams(
                dimension_semantics=("parallel",),
                vmem_limit_bytes=vmem_limit),
            cost_estimate=cost,
        )(x_pad, prepared["wf"], prepared["bf"])

    if (Bp, fout_p) == (B, fout):
        return out
    return out[:B, :fout]


# --------------------------------------------------------------------------
# Parameter init mimicking the PyTorch module, plus a plain-JAX reference.
# --------------------------------------------------------------------------
def init_equal_linear_params(key, fin, fout, lr_mul):
    kw, kb = jax.random.split(key)
    # kaiming_uniform_(a=sqrt(5)/lr_mul): bound = gain*sqrt(3/fan_in),
    # gain = sqrt(2/(1+a^2)), fan_in = fin.
    a = math.sqrt(5.0) / lr_mul
    gain = math.sqrt(2.0 / (1.0 + a * a))
    w_bound = gain * math.sqrt(3.0 / fin)
    w = jax.random.uniform(kw, (fout, fin), jnp.float32, -w_bound, w_bound)
    b_bound = 1.0 / (math.sqrt(fin) * lr_mul)
    b = jax.random.uniform(kb, (fout,), jnp.float32, -b_bound, b_bound)
    return w, b


def equal_linear_block_params(key, fin, fout, n_layers, lr_mul):
    params = []
    keys = jax.random.split(key, n_layers + 1)
    for i in range(n_layers):
        params.append(init_equal_linear_params(keys[i], fin, fin, lr_mul))
    params.append(init_equal_linear_params(keys[n_layers], fin, fout, lr_mul))
    return params


def _reference_forward(x, params, *, lr_mul, leaky_slope=0.2):
    # Full-f32 reference of the PyTorch semantics.
    for (w, b) in params[:-1]:
        y = x @ (w * lr_mul).T + b * lr_mul
        x = jnp.where(y >= 0.0, y, leaky_slope * y)
    w, b = params[-1]
    return x @ (w * lr_mul).T + b * lr_mul


if __name__ == "__main__":
    fin, fout, n_layers, lr_mul = 32, 16, 2, 0.01
    batch = 8

    key = jax.random.PRNGKey(0)
    k_x, k_p = jax.random.split(key)
    x = jax.random.normal(k_x, (batch, fin), jnp.float32)
    params = equal_linear_block_params(k_p, fin, fout, n_layers, lr_mul)

    # One-time param transform (lr_mul fold, transpose, bf16, padding) outside
    # the forward hot path; forward is a single layer-streamed pallas_call.
    prepared = prepare_equal_linear_block(params, lr_mul=lr_mul)

    out = equal_linear_block_forward(x, prepared, leaky_slope=0.2)
    out = jax.block_until_ready(out)

    ref = _reference_forward(x, params, lr_mul=lr_mul)
    assert out.shape == (batch, fout)
    # Tolerance loosened vs. the full-f32 reference because weights are stored
    # in bf16 (biases stay f32, so the bias-dominated output error stays tiny).
    assert jnp.allclose(out, ref, atol=1e-3, rtol=1e-2), \
        float(jnp.max(jnp.abs(out - ref)))

    print("KERNEL_OK")
</pallas_src>

<mosaic_0001>
module attributes {stable_mosaic.version = 11 : i64} {
  func.func @_block_kernel(%arg0: i32, %arg1: i32, %arg2: memref<8x128xf32, #tpu.memory_space<vmem>>, %arg3: memref<1x128x128xbf16, #tpu.memory_space<vmem>>, %arg4: memref<1x1x128xf32, #tpu.memory_space<vmem>>, %arg5: memref<128x128xbf16, #tpu.memory_space<vmem>>, %arg6: memref<1x128xf32, #tpu.memory_space<vmem>>, %arg7: memref<8x128xf32, #tpu.memory_space<vmem>>, %arg8: memref<8x128xf32, #tpu.memory_space<vmem>>) attributes {dimension_semantics = [#tpu.dimension_semantics<parallel>, #tpu.dimension_semantics<arbitrary>], iteration_bounds = array<i64: 1, 2>, scalar_prefetch = 0 : i64, scratch_operands = 1 : i64, tpu.core_type = #tpu.core_type<tc>, window_params = [{transform_indices = @transform_0, window_bounds = array<i64: 8, 128>}, {transform_indices = @transform_1, window_bounds = array<i64: 1, 128, 128>}, {transform_indices = @transform_2, window_bounds = array<i64: 1, 1, 128>}, {pipeline_mode = #tpu.pipeline_mode<synchronous>, transform_indices = @transform_3, window_bounds = array<i64: 128, 128>}, {pipeline_mode = #tpu.pipeline_mode<synchronous>, transform_indices = @transform_4, window_bounds = array<i64: 1, 128>}, {transform_indices = @transform_5, window_bounds = array<i64: 8, 128>}]} {
    %c0_i32 = arith.constant 0 : i32
    %0 = arith.cmpi eq, %arg1, %c0_i32 : i32
    %1 = arith.extui %0 : i1 to i32
    %c0_i32_0 = arith.constant 0 : i32
    %2 = arith.cmpi ne, %1, %c0_i32_0 : i32
    scf.if %2 {
      %c0_13 = arith.constant 0 : index
      %c0_14 = arith.constant 0 : index
      %21 = vector.load %arg2[%c0_13, %c0_14] : memref<8x128xf32, #tpu.memory_space<vmem>>, vector<8x128xf32>
      %c0_15 = arith.constant 0 : index
      %c0_16 = arith.constant 0 : index
      %22 = vector.load %arg8[%c0_15, %c0_16] : memref<8x128xf32, #tpu.memory_space<vmem>>, vector<8x128xf32>
      tpu.vector_store %arg8[%c0_15, %c0_16], %21 {strides = array<i32>} : memref<8x128xf32, #tpu.memory_space<vmem>>, vector<8x128xf32>,
    } else {
    }
    %c0 = arith.constant 0 : index
    %c0_1 = arith.constant 0 : index
    %3 = vector.load %arg8[%c0, %c0_1] : memref<8x128xf32, #tpu.memory_space<vmem>>, vector<8x128xf32>
    %4 = arith.truncf %3 : vector<8x128xf32> to vector<8x128xbf16>
    %c0_2 = arith.constant 0 : index
    %c0_3 = arith.constant 0 : index
    %c0_4 = arith.constant 0 : index
    %5 = vector.load %arg3[%c0_2, %c0_3, %c0_4] : memref<1x128x128xbf16, #tpu.memory_space<vmem>>, vector<1x128x128xbf16>
    %6 = vector.shape_cast %5 : vector<1x128x128xbf16> to vector<128x128xbf16>
    %cst = arith.constant dense<0.000000e+00> : vector<8x128xf32>
    %7 = tpu.matmul %4, %6, %cst {dimension_numbers = #tpu.dot_dimension_numbers<[1], [0], [0], [1], [0, 0, 1, 1], [], []>} : vector<8x128xbf16>, vector<128x128xbf16>, vector<8x128xf32> -> vector<8x128xf32>
    %c0_5 = arith.constant 0 : index
    %c0_6 = arith.constant 0 : index
    %c0_7 = arith.constant 0 : index
    %8 = vector.load %arg4[%c0_5, %c0_6, %c0_7] : memref<1x1x128xf32, #tpu.memory_space<vmem>>, vector<1x1x128xf32>
    %9 = vector.shape_cast %8 : vector<1x1x128xf32> to vector<1x128xf32>
    %10 = vector.broadcast %9 : vector<1x128xf32> to vector<8x128xf32>
    %11 = arith.addf %7, %10 : vector<8x128xf32>
    %cst_8 = arith.constant 0.000000e+00 : f32
    %12 = vector.broadcast %cst_8 : f32 to vector<8x128xf32>
    %13 = arith.cmpf oge, %11, %12 : vector<8x128xf32>
    %cst_9 = arith.constant 2.000000e-01 : f32
    %14 = vector.broadcast %cst_9 : f32 to vector<8x128xf32>
    %15 = arith.mulf %11, %14 : vector<8x128xf32>
    %16 = arith.select %13, %11, %15 : vector<8x128xi1>, vector<8x128xf32>
    %c0_10 = arith.constant 0 : index
    %c0_11 = arith.constant 0 : index
    %17 = vector.load %arg8[%c0_10, %c0_11] : memref<8x128xf32, #tpu.memory_space<vmem>>, vector<8x128xf32>
    tpu.vector_store %arg8[%c0_10, %c0_11], %16 {strides = array<i32>} : memref<8x128xf32, #tpu.memory_space<vmem>>, vector<8x128xf32>,
    %c1_i32 = arith.constant 1 : i32
    %18 = arith.cmpi eq, %arg1, %c1_i32 : i32
    %19 = arith.extui %18 : i1 to i32
    %c0_i32_12 = arith.constant 0 : i32
    %20 = arith.cmpi ne, %19, %c0_i32_12 : i32
    scf.if %20 {
      %c0_13 = arith.constant 0 : index
      %c0_14 = arith.constant 0 : index
      %21 = vector.load %arg8[%c0_13, %c0_14] : memref<8x128xf32, #tpu.memory_space<vmem>>, vector<8x128xf32>
      %22 = arith.truncf %21 : vector<8x128xf32> to vector<8x128xbf16>
      %c0_15 = arith.constant 0 : index
      %c0_16 = arith.constant 0 : index
      %23 = vector.load %arg5[%c0_15, %c0_16] : memref<128x128xbf16, #tpu.memory_space<vmem>>, vector<128x128xbf16>
      %cst_17 = arith.constant dense<0.000000e+00> : vector<8x128xf32>
      %24 = tpu.matmul %22, %23, %cst_17 {dimension_numbers = #tpu.dot_dimension_numbers<[1], [0], [0], [1], [0, 0, 1, 1], [], []>} : vector<8x128xbf16>, vector<128x128xbf16>, vector<8x128xf32> -> vector<8x128xf32>
      %c0_18 = arith.constant 0 : index
      %c0_19 = arith.constant 0 : index
      %25 = vector.load %arg6[%c0_18, %c0_19] : memref<1x128xf32, #tpu.memory_space<vmem>>, vector<1x128xf32>
      %26 = vector.broadcast %25 : vector<1x128xf32> to vector<8x128xf32>
      %27 = arith.addf %24, %26 : vector<8x128xf32>
      %c0_20 = arith.constant 0 : index
      %c0_21 = arith.constant 0 : index
      %28 = vector.load %arg7[%c0_20, %c0_21] : memref<8x128xf32, #tpu.memory_space<vmem>>, vector<8x128xf32>
      tpu.vector_store %arg7[%c0_20, %c0_21], %27 {strides = array<i32>} : memref<8x128xf32, #tpu.memory_space<vmem>>, vector<8x128xf32>,
    } else {
    }
    return
  }
  func.func @transform_0(%arg0: i32, %arg1: i32) -> (i32, i32) {
    %c0_i32 = arith.constant 0 : i32
    %c0_i32_0 = arith.constant 0 : i32
    return %arg0, %c0_i32 : i32, i32
  }
  func.func @transform_1(%arg0: i32, %arg1: i32) -> (i32, i32, i32) {
    %c0_i32 = arith.constant 0 : i32
    %c0_i32_0 = arith.constant 0 : i32
    %c0_i32_1 = arith.constant 0 : i32
    return %arg1, %c0_i32, %c0_i32_0 : i32, i32, i32
  }
  func.func @transform_2(%arg0: i32, %arg1: i32) -> (i32, i32, i32) {
    %c0_i32 = arith.constant 0 : i32
    %c0_i32_0 = arith.constant 0 : i32
    %c0_i32_1 = arith.constant 0 : i32
    return %arg1, %c0_i32, %c0_i32_0 : i32, i32, i32
  }
  func.func @transform_3(%arg0: i32, %arg1: i32) -> (i32, i32) {
    %c0_i32 = arith.constant 0 : i32
    %c0_i32_0 = arith.constant 0 : i32
    %c0_i32_1 = arith.constant 0 : i32
    return %c0_i32, %c0_i32_0 : i32, i32
  }
  func.func @transform_4(%arg0: i32, %arg1: i32) -> (i32, i32) {
    %c0_i32 = arith.constant 0 : i32
    %c0_i32_0 = arith.constant 0 : i32
    %c0_i32_1 = arith.constant 0 : i32
    return %c0_i32, %c0_i32_0 : i32, i32
  }
  func.func @transform_5(%arg0: i32, %arg1: i32) -> (i32, i32) {
    %c0_i32 = arith.constant 0 : i32
    %c0_i32_0 = arith.constant 0 : i32
    return %arg0, %c0_i32 : i32, i32
  }
}

</mosaic_0001>

<bundles_post_ra>
// kernel: tpu_custom_call.1
= control target key start
LH: loop header
LB: loop body
LE: loop exit
PB: predicated region body
PF: predicated region fallthrough
CT: control target
= control target key end

     0   :  { %10 = vsyncpa [#allocation4], 0  ;;  %s1297_s0 = inlined_call_operand.hbm [shape: f32[8,128], index: 0, kind: input, shape index: {}]   ;;  %s1298_s1 = inlined_call_operand.hbm [shape: bf16[2,128,128], index: 1, kind: input, shape index: {}]   ;;  %s1299_s2 = inlined_call_operand.vmem [shape: f32[2,1,128], index: 2, kind: input, shape index: {}]   ;;  %s1300_s3 = inlined_call_operand.hbm [shape: bf16[128,128], index: 3, kind: input, shape index: {}]   ;;  %s1301_s4 = inlined_call_operand.vmem [shape: f32[1,128], index: 4, kind: input, shape index: {}]   ;;  %s1302_s5 = inlined_call_operand.hbm [shape: f32[8,128], index: 5, kind: output, shape index: {}]  }
   0x1   :  { %11 = vsyncpa [#allocation7], 0 }
   0x2   :  { %13 = vsyncpa [#allocation7 + $0x1], 0 }
   0x3   :  { %14 = vsyncpa [#allocation5], 0  ;;  %s1056_s18 = smov 0   ;;  %s1058_s19 = smov 0  }
   0x4   :  { %s1060_s20 = smov 0   ;;  %s1062_s21 = smov 0  }
   0x5   :  { %s1064_s22 = smov 0   ;;  %s1066_s23 = smov 0  }
   0x6 LB: > { %s1085_s24 = sadd.s32 4294967295, %s1014_s23   ;;  %p72_p0 = scmp.ne.s32.totalorder %s1002_s20, %s998_s19  ;;  %s1014_s23 = sphi %s1066_s23, %s20_s23   ;;  %s1010_s22 = sphi %s1064_s22, %s1322_s22   ;;  %s1006_s21 = sphi %s1062_s21, %s1321_s21   ;;  %s1002_s20 = sphi %s1060_s20, %s1320_s20   ;;  %s998_s19 = sphi %s1058_s19, %s1319_s19   ;;  %s994_s18 = sphi %s1056_s18, %s1318_s18  }
   0x7   : > { %p73_p1 = scmp.eq.s32.totalorder %s1014_s23, 0  ;;  %p78_p2 = scmp.ne.s32.totalorder %s998_s19, %s994_s18 }
   0x8   : > { %p1303_p3 = scmp.eq.s32.totalorder %s1085_s24, 0  ;;  %p641_p4 = scmp.ge.s32.totalorder %s1014_s23, 1 }
   0x9   : > { %p74_p5 = por %p73_p1, %p72_p0  ;;  %p183_p6 = scmp.lt.s32.totalorder %s1014_s23, 3 }
   0xa   : > { %p1096_p7 = por %p1303_p3, %p78_p2  ;;  %s1016_s27 = smov [#allocation8]  }
   0xb   : > { %p1100_p8 = pnand %p641_p4, %p183_p6  ;;  %s208_s28 = sshll.u32 %s1016_s27, 4  ;;  %s209_s28 = int_to_ptr.vmem [resolvable:$true] %s208_s28 }
   0xc   : > { %s1307_s25 = scalar_select %p1096_p7, 1, 0 }
   0xd   : > { %s1308_s26 = scalar_select %p1100_p8, 1, 0 }
   0xe   : > { %p749_p9 = pneg %p1100_p8  ;;  %p762_p11 = scmp.lt.s32.totalorder %s1014_s23, 2 }
   0xf   : > { %s840_s8 = scalar_lea.hbm %s1300_s3, 1024 }
  0x10   : > { %p1108_p10 = pnand %p749_p9, %p1303_p3  ;;  %p1113_p12 = pnand %p762_p11, %p74_p5 }
  0x11   : > { %p841_p13 = scmp.ne.s32.totalorder %s1300_s3, %s840_s8  ;;  %p847_p4 = scmp.lt.u32.totalorder %s840_s8, %s1300_s3 }
  0x12   : > { %s1310_s30 = scalar_select %p1113_p12, 1, 0 }
  0x13   : > { %p842_p0 = pneg %p1108_p10 }
  0x15   : > { %p843_p1 = pnand %p842_p0, %p841_p13 }
  0x17   : > { %p844_p2 = pneg %p843_p1 }
  0x19   : > { %p849_p5 = pnand %p847_p4, %p844_p2 }
  0x1b   : > { %852 = shalt.err (!%p849_p5)
}
  0x1c   : > { %s853_s13 = scalar_lea.vmem %s209_s28, 1024  ;;  %p861_p3 = scmp.lt.s32.totalorder %s209_s28, %s209_s28 }
  0x1d   : > { %p854_p6 = scmp.ne.s32.totalorder %s209_s28, %s853_s13  ;;  %p862_p7 = scmp.lt.s32.totalorder %s853_s13, %s853_s13 }
  0x1f   : > { %p856_p9 = pnand %p854_p6, %p842_p0  ;;  %p863_p8 = por %p862_p7, %p861_p3 }
  0x21   : > { %p857_p11 = pneg %p856_p9 }
  0x23   : > { %p864_p12 = pnand %p863_p8, %p857_p11 }
  0x25   : > { %867 = shalt.err (!%p864_p12)
}
  0x26   : > { %s1017_s14 = smov 64   ;;  %s1018_s15 = smov 4  }
  0x27   : > { %755 = dma.hbm_to_vmem [thread:$0]  (!%p1108_p10), %s1300_s3, 1024, %s209_s28, [#allocation7], %s1017_s14, %s1017_s14, %s1018_s15  }
  0x28   : > { %s1019_s18 = smov [#allocation3]   ;;  %s868_s8 = scalar_lea.hbm %s1297_s0, 128 }
  0x29   : > { %s198_s27 = sshll.u32 %s1019_s18, 4  ;;  %p869_p3 = scmp.ne.s32.totalorder %s1297_s0, %s868_s8  ;;  %s199_s27 = int_to_ptr.vmem [resolvable:$true] %s198_s27 }
  0x2a   : > { %p875_p12 = scmp.lt.u32.totalorder %s868_s8, %s1297_s0 }
  0x2b   : > { %p871_p7 = pnand %p869_p3, %p842_p0 }
  0x2d   : > { %p872_p8 = pneg %p871_p7 }
  0x2f   : > { %p877_p13 = pnand %p875_p12, %p872_p8 }
  0x31   : > { %880 = shalt.err (!%p877_p13)
}
  0x32   : > { %s881_s28 = scalar_lea.vmem %s199_s27, 128  ;;  %p889_p5 = scmp.lt.s32.totalorder %s199_s27, %s199_s27 }
  0x33   : > { %p882_p1 = scmp.ne.s32.totalorder %s199_s27, %s881_s28  ;;  %p890_p6 = scmp.lt.s32.totalorder %s881_s28, %s881_s28 }
  0x35   : > { %p884_p2 = pnand %p882_p1, %p842_p0  ;;  %p891_p9 = por %p890_p6, %p889_p5 }
  0x37   : > { %p885_p4 = pneg %p884_p2 }
  0x39   : > { %p892_p11 = pnand %p891_p9, %p885_p4 }
  0x3b   : > { %895 = shalt.err (!%p892_p11)
}
  0x3c   : > { %752 = dma.hbm_to_vmem [thread:$0]  (!%p1108_p10), %s1297_s0, 128, %s199_s27, [#allocation4]  }
  0x3d   : > { %s29_s17 = sadd.s32 1, %s1010_s22  ;;  %s65_s18 = sadd.s32 1, %s1002_s20 }
  0x3e   : > { %p30_p0 = scmp.ge.s32.totalorder %s29_s17, 2  ;;  %s225_s6 = sand.u32 1, %s1014_s23  }
  0x3f   : > { %s227_s7 = sand.u32 1, %s1002_s20   ;;  %s676_s8 = sshll.u32 %s1010_s22, 10 }
  0x40   : > { %s1324_s17 = smov (%p30_p0, %s29_s17), 0  ;;  %s645_s29 = sshll.u32 %s227_s7, 6 }
  0x41   : > { %s62_s9 = ssub.s32 %s1010_s22, %s1324_s17  ;;  %s1174_s12 = scalar_lea.hbm %s1298_s1, %s676_s8 }
  0x42   : > { %p63_p3 = scmp.eq.s32.totalorder %s62_s9, 0  ;;  %s229_s27 = scalar_lea.vmem [#allocation6], %s645_s29 }
  0x43   : > { %s236_s28 = sshll.u32 %s229_s27, 4  ;;  %s1181_s16 = scalar_lea.sflag [#allocation7], %s225_s6  ;;  %s1179_s28 = int_to_ptr.vmem [resolvable:$true] %s236_s28 }
  0x44   : > { %s1177_s13 = scalar_select %p63_p3, %s1002_s20, %s65_s18  }
  0x45   : > { %s896_s7 = scalar_lea.hbm %s1174_s12, 1024  ;;  %p1311_p7 = scmp.ne.s32.totalorder %s1310_s30, 0 }
  0x46   : > { %p897_p10 = scmp.ne.s32.totalorder %s1174_s12, %s896_s7  ;;  %s901_s10 = scalar_lea.hbm %s1298_s1, 2048 }
  0x47   : > { %p898_p8 = pneg %p1311_p7  ;;  %p902_p1 = scmp.lt.u32.totalorder %s1174_s12, %s1298_s1 }
  0x48   : > { %p903_p2 = scmp.lt.u32.totalorder %s901_s10, %s896_s7  ;;  %p905_p5 = scmp.lt.u32.totalorder %s896_s7, %s1174_s12 }
  0x49   : > { %p899_p12 = pnand %p898_p8, %p897_p10 }
  0x4a   : > { %p904_p4 = por %p903_p2, %p902_p1 }
  0x4b   : > { %p900_p13 = pneg %p899_p12 }
  0x4c   : > { %p906_p6 = por %p905_p5, %p904_p4 }
  0x4e   : > { %p907_p9 = pnand %p906_p6, %p900_p13 }
  0x50   : > { %910 = shalt.err (!%p907_p9)
}
  0x51   : > { %s911_s18 = scalar_lea.vmem %s1179_s28, 1024  ;;  %s1020_s6 = smov [#allocation6]  }
  0x52   : > { %p912_p11 = scmp.ne.s32.totalorder %s1179_s28, %s911_s18  ;;  %s916_s27 = sshll.u32 %s1020_s6, 4  ;;  %s917_s27 = int_to_ptr.vmem [resolvable:$false] %s916_s27 }
  0x53   : > { %s918_s8 = scalar_lea.vmem %s917_s27, 2048  ;;  %p919_p10 = scmp.lt.s32.totalorder %s1179_s28, %s917_s27 }
  0x54   : > { %p914_p0 = pnand %p912_p11, %p898_p8  ;;  %p920_p12 = scmp.lt.s32.totalorder %s918_s8, %s911_s18 }
  0x56   : > { %p915_p3 = pneg %p914_p0  ;;  %p921_p1 = por %p920_p12, %p919_p10 }
  0x58   : > { %p922_p2 = pnand %p921_p1, %p915_p3 }
  0x5a   : > { %925 = shalt.err (!%p922_p2)
}
  0x5b   : > { %759 = dma.hbm_to_vmem [thread:$0]  (!%p1311_p7), %s1174_s12, 1024, %s1179_s28, %s1181_s16, %s1017_s14, %s1017_s14, %s1018_s15  }
  0x5c   : > { %p1312_p8 = scmp.ne.s32.totalorder %s1308_s26, 0 }
  0x5d   : > { %p1313_p13 = scmp.eq.s32.totalorder (!%p1312_p8), %s1085_s24, 0 }
  0x5e   : > { %254 = sbr.rel (%p1312_p8) target bundleno = 620 (0x26c), region = 40 }
  0x65   : > { %977 = dma.done.wait (%p1313_p13), [#allocation4], 128   ;;  %p1314_p4 = pmov %p1313_p13 }
  0x66   : > { %s260_s30 = sand.u32 1, %s1085_s24   ;;  %s262_s7 = sand.u32 1, %s998_s19  }
  0x67   : > { %979 = vsyncadd (%p1314_p4), [#allocation4], 4294967168  ;;  %s650_s9 = sshll.u32 %s262_s7, 6  ;;  %s261_s10 = scalar_lea.sflag [#allocation7], %s260_s30 }
  0x68   : > { %s1220_s29 = scalar_lea.vmem [#allocation6], %s650_s9  ;;  %p1315_p5 = scmp.ne.s32.totalorder %s1307_s25, 0 }
  0x6a   : > { %981 = dma.done.wait (%p1315_p5), %s261_s10, 1024  }
  0x6b   : > { %983 = vsyncadd (%p1315_p5), %s261_s10, 4294966272  ;;  %p1316_p7 = pmov %p1314_p4 }
  0x6c   : > { %p1317_p6 = pmov %p1314_p4 }
  0x6d   : > { %985 = dma.done.wait (%p1316_p7), [#allocation7], 1024  }
  0x6e   : > { %987 = vsyncadd (%p1317_p6), [#allocation7], 4294966272  ;;  %p293_p9 = scmp.lt.s32.totalorder %s1006_s21, 1  ;;  %p652_p11 = scmp.ne.s32.totalorder %s1006_s21, 0 }
  0x6f   : > { %v301_v0 = vld [vmem:[#allocation3] sm:$0xff] (!%p652_p11) }
  0x70   : > { %s1232_s26 = scalar_select %p293_p9, %s1006_s21, 1 }
  0x71   : > { %300 = sbr.rel (%p652_p11) target bundleno = 120 (0x78), region = 56  ;;  %302 = vst [vmem:[#allocation2] sm:$0xff] (!%p652_p11), %v301_v0 }
  0x72   : > { %s295_s12 = scalar_lea.vmem %s1299_s2, %s1232_s26 }
  0x78 PF: > { %v824_v1 = vld [vmem:[%s1220_s29] sm:$0xff]   ;;  %v1021_v2 = vmov 0.0   ;;  %v825_v3 = vld [vmem:[%s1220_s29 + $0x8] sm:$0xff]   ;;  %vm1022_vm0 = vmmov 0   ;;  %v826_v4 = vld [vmem:[%s1220_s29 + $0x10] sm:$0xff]   ;;  %p662_p0 = scmp.ne.s32.totalorder %s1006_s21, 1 }
  0x79   : > { %695 = vmatprep.subr.bf16.mxu0 %v1021_v2  ;;  %711 = vmatprep.mubr.msk.bf16.mxu0 %vm1022_vm0, %v1021_v2  ;;  %v827_v5 = vld [vmem:[%s1220_s29 + $0x18] sm:$0xff]   ;;  %v828_v6 = vld [vmem:[%s1220_s29 + $0x20] sm:$0xff]   ;;  %v829_v7 = vld [vmem:[%s1220_s29 + $0x28] sm:$0xff]   ;;  %v1023_v21 = vmov (!%p662_p0), 0.0   ;;  %vm1024_vm2 = vmmov (!%p662_p0), 0  }
  0x7a   : > { %696 = vmatpush3.bf16.msra.mxu0 %v824_v1  ;;  %v830_v8 = vld [vmem:[%s1220_s29 + $0x30] sm:$0xff]   ;;  %v831_v9 = vld [vmem:[%s1220_s29 + $0x38] sm:$0xff]   ;;  %v832_v20 = vld [vmem:[#allocation8] sm:$0xff] (!%p662_p0)  }
  0x7b   : > { %697 = vmatprep.subr.bf16.mxu0 %v1021_v2  ;;  %v303_v10 = vld [vmem:[#allocation2] sm:$0xff]  ;;  %v833_v22 = vld [vmem:[#allocation8 + $0x8] sm:$0xff] (!%p662_p0)   ;;  %v835_v24 = vld [vmem:[#allocation8 + $0x18] sm:$0xff] (!%p662_p0)  }
  0x7c   : > { %v304_v11 = vpack.c.bf16 %v303_v10, %v303_v10  ;;  %v653_v12 = vld [vmem:[%s295_s12] ss:$0 sm:$0xff]  ;;  %v836_v25 = vld [vmem:[#allocation8 + $0x20] sm:$0xff] (!%p662_p0)   ;;  %v837_v26 = vld [vmem:[#allocation8 + $0x28] sm:$0xff] (!%p662_p0)  }
  0x7d   : > { %v834_v23 = vld [vmem:[#allocation8 + $0x10] sm:$0xff] (!%p662_p0)   ;;  %v839_v28 = vld [vmem:[#allocation8 + $0x38] sm:$0xff] (!%p662_p0)  }
  0x7e   : > { %698 = vmatpush3.bf16.msra.mxu0 %v825_v3  ;;  %v838_v27 = vld [vmem:[#allocation8 + $0x30] sm:$0xff] (!%p662_p0)  }
  0x7f   : > { %699 = vmatprep.subr.bf16.mxu0 %v1021_v2  ;;  %v663_v31 = vld [vmem:[%s1301_s4] ss:$0 sm:$0xff] (!%p662_p0) }
  0x82   : > { %700 = vmatpush3.bf16.msra.mxu0 %v826_v4 }
  0x83   : > { %701 = vmatprep.subr.bf16.mxu0 %v1021_v2 }
  0x86   : > { %702 = vmatpush3.bf16.msra.mxu0 %v827_v5 }
  0x87   : > { %703 = vmatprep.subr.bf16.mxu0 %v1021_v2 }
  0x8a   : > { %704 = vmatpush3.bf16.msra.mxu0 %v828_v6 }
  0x8b   : > { %705 = vmatprep.subr.bf16.mxu0 %v1021_v2 }
  0x8e   : > { %706 = vmatpush3.bf16.msra.mxu0 %v829_v7 }
  0x8f   : > { %707 = vmatprep.subr.bf16.mxu0 %v1021_v2 }
  0x92   : > { %708 = vmatpush3.bf16.msra.mxu0 %v830_v8 }
  0x93   : > { %709 = vmatprep.subr.bf16.mxu0 %v1021_v2 }
  0x96   : > { %710 = vmatpush3.bf16.msra.mxu0 %v831_v9 }
  0x97   : > { %715 = vmatprep.subr.bf16.mxu0 (!%p662_p0), %v1023_v21 }
  0x99   : > { %712 = vmatmul.mubr.bf16.vlgmr.msra.gmra.mrb[0].mxu0 %v304_v11 }
  0x9a   : > { %716 = vmatpush3.bf16.msra.mxu0 (!%p662_p0), %v832_v20  ;;  %731 = vmatprep.mubr.msk.bf16.mxu0 (!%p662_p0), %vm1024_vm2, %v1023_v21 }
  0x9b   : > { %717 = vmatprep.subr.bf16.mxu0 (!%p662_p0), %v1023_v21 }
  0x9e   : > { %718 = vmatpush3.bf16.msra.mxu0 (!%p662_p0), %v833_v22 }
  0x9f   : > { %719 = vmatprep.subr.bf16.mxu0 (!%p662_p0), %v1023_v21 }
  0xa2   : > { %720 = vmatpush3.bf16.msra.mxu0 (!%p662_p0), %v834_v23 }
  0xa3   : > { %721 = vmatprep.subr.bf16.mxu0 (!%p662_p0), %v1023_v21 }
  0xa6   : > { %722 = vmatpush3.bf16.msra.mxu0 (!%p662_p0), %v835_v24 }
  0xa7   : > { %723 = vmatprep.subr.bf16.mxu0 (!%p662_p0), %v1023_v21 }
  0xaa   : > { %724 = vmatpush3.bf16.msra.mxu0 (!%p662_p0), %v836_v25 }
  0xab   : > { %725 = vmatprep.subr.bf16.mxu0 (!%p662_p0), %v1023_v21 }
  0xae   : > { %726 = vmatpush3.bf16.msra.mxu0 (!%p662_p0), %v837_v26 }
  0xaf   : > { %727 = vmatprep.subr.bf16.mxu0 (!%p662_p0), %v1023_v21 }
  0xb2   : > { %728 = vmatpush3.bf16.msra.mxu0 (!%p662_p0), %v838_v27 }
  0xb3   : > { %729 = vmatprep.subr.bf16.mxu0 (!%p662_p0), %v1023_v21 }
  0xb6   : > { %730 = vmatpush3.bf16.msra.mxu0 (!%p662_p0), %v839_v28 }
 0x16c   : > { %v410_v13 = vpop.f32.mrb[0].mxu0  ;;  %423 = sbr.rel (%p662_p0) target bundleno = 595 (0x253), region = 60 }
 0x16d   : > { %v411_v14 = vadd.f32 %v653_v12, %v410_v13  ;;  %v713_v15 = vpop.f32.mrb[1].mxu0 }
 0x16e   : > { %v413_v16 = vpop.f32.mrb[2].mxu0 }
 0x16f   : > { %vm416_vm1 = vcmp.ge.f32.partialorder %v411_v14, 0.0  ;;  %v417_v17 = vmul.f32 0.2, %v411_v14  ;;  %v714_v18 = vpop.f32.mrb[3].mxu0 }
 0x171   : > { %v418_v19 = vsel %vm416_vm1, %v411_v14, %v417_v17 }
 0x172   : > { %419 = vst [vmem:[#allocation2] sm:$0xff] %v418_v19 }
 0x179   : > { %v424_v29 = vld [vmem:[#allocation2] sm:$0xff] }
 0x17a   : > { %v425_v30 = vpack.c.bf16 %v424_v29, %v424_v29 }
 0x17c   : > { %732 = vmatmul.mubr.bf16.vlgmr.msra.gmra.mrb[0].mxu0 %v425_v30 }
 0x24f   : > { %v531_v32 = vpop.f32.mrb[0].mxu0 }
 0x250   : > { %v532_v33 = vadd.f32 %v663_v31, %v531_v32  ;;  %v733_v34 = vpop.f32.mrb[1].mxu0 }
 0x251   : > { %v534_v35 = vpop.f32.mrb[2].mxu0 }
 0x252   : > { %537 = vst [vmem:[#allocation9] sm:$0xff] %v532_v33  ;;  %v734_v36 = vpop.f32.mrb[3].mxu0 }
 0x253 PF: > { %p765_p3 = scmp.eq.s32.totalorder %s1085_s24, 1  ;;  %s1025_s11 = smov [#allocation9]  }
 0x254   : > { %s547_s18 = sshll.u32 %s1025_s11, 4  ;;  %s548_s18 = int_to_ptr.vmem [resolvable:$true] %s547_s18 }
 0x255   : > { %s926_s6 = scalar_lea.vmem %s548_s18, 128  ;;  %p933_p2 = scmp.lt.s32.totalorder %s548_s18, %s548_s18 }
 0x256   : > { %p927_p10 = scmp.ne.s32.totalorder %s548_s18, %s926_s6  ;;  %p934_p8 = scmp.lt.s32.totalorder %s926_s6, %s926_s6 }
 0x258   : > { %p928_p12 = pnand %p927_p10, %p765_p3  ;;  %p935_p13 = por %p934_p8, %p933_p2 }
 0x25a   : > { %p929_p1 = pneg %p928_p12 }
 0x25c   : > { %p936_p4 = pnand %p935_p13, %p929_p1 }
 0x25e   : > { %939 = shalt.err (!%p936_p4)
}
 0x25f   : > { %s940_s30 = scalar_lea.hbm %s1302_s5, 128 }
 0x260   : > { %p941_p5 = scmp.ne.s32.totalorder %s1302_s5, %s940_s30  ;;  %p946_p9 = scmp.lt.u32.totalorder %s940_s30, %s1302_s5 }
 0x262   : > { %p942_p7 = pnand %p941_p5, %p765_p3 }
 0x264   : > { %p943_p6 = pneg %p942_p7 }
 0x266   : > { %p948_p11 = pnand %p946_p9, %p943_p6 }
 0x268   : > { %951 = shalt.err (!%p948_p11)
}
 0x269   : > { %746 = dma.vmem_to_hbm [thread:$0]  (%p765_p3), %s548_s18, 128, %s1302_s5, [#allocation5]  }
 0x26a   : > { %989 = dma.done.wait (%p765_p3), [#allocation5], 128  }
 0x26b   : > { %991 = vsyncadd (%p765_p3), [#allocation5], 4294967168 }
 0x26c PF: > { %s20_s23 = sadd.s32 1, %s1014_s23   ;;  %s1318_s18 = smov %s998_s19 }
 0x26d   : > { %p17_p0 = scmp.ge.s32.totalorder %s20_s23, 4   ;;  %s1319_s19 = smov %s1002_s20 }
 0x26e   : > { %s1320_s20 = smov %s1177_s13  ;;  %s1321_s21 = smov %s1010_s22 }
 0x26f   : > { %s1322_s22 = smov %s1324_s17  ;;  %19 = sbr.rel (!%p17_p0) target bundleno = 6 (0x6), region = 99 }
 0x276   :  { %560 = vsyncpa [#allocation4], 1 }
 0x277   :  { %562 = vsyncpa [#allocation4 + $0x1], 1 }
 0x278   :  { %563 = vsyncpa [#allocation7], 1 }
 0x279   :  { %565 = vsyncpa [#allocation7 + $0x1], 1 }
 0x27a   :  { %566 = vsyncpa [#allocation5], 1 }
 0x27b   :  { %568 = vsyncpa [#allocation5 + $0x1], 1 }

</bundles_post_ra>
